<compile_context>
chip_gen: v5e
topology: v5e:2x2
jax: 0.10.0
libtpu: 0.0.40
codegen_flags: <defaults>
</compile_context>

<pallas_src>
import numpy as np
import jax
import jax.numpy as jnp
from jax.experimental import pallas as pl
from jax.experimental.pallas import tpu as pltpu


# ----------------------------------------------------------------------------
# VMEM budget (v7x has 64 MiB physical; v5e/v6e have 128 MiB)
# ----------------------------------------------------------------------------
def _detect_vmem_budget():
    try:
        info = pltpu.get_tpu_info()
        cap = getattr(info, "vmem_capacity_bytes", None)
        if cap:
            return int(min(cap * 3 // 4, 100 << 20))
    except Exception:
        pass
    return 48 << 20          # safe default for v7x's 64 MiB


_VMEM_BUDGET = _detect_vmem_budget()


def _cparams(grid_rank):
    return pltpu.CompilerParams(
        dimension_semantics=("parallel",) * grid_rank,
        vmem_limit_bytes=_VMEM_BUDGET)


# ----------------------------------------------------------------------------
# Fused matmul kernel: out = act((A @ B) * scale + bias [+ residual])
# bf16 MXU operands, f32 accumulate/epilogue, K never tiled (weights resident).
# ----------------------------------------------------------------------------
def _make_matmul_kernel(relu, has_res):
    def kernel(a_ref, b_ref, s_ref, c_ref, *rest):
        if has_res:
            r_ref, o_ref = rest
        else:
            (o_ref,) = rest
        y = jnp.dot(a_ref[...], b_ref[...], preferred_element_type=jnp.float32)
        y = y * s_ref[...] + c_ref[...]
        if has_res:
            y = y + r_ref[...].astype(jnp.float32)
        if relu:
            y = jnp.maximum(y, 0.0)
        o_ref[...] = y.astype(o_ref.dtype)
    return kernel


_TM_CANDIDATES = (4096, 2048, 1024, 512, 256, 128, 64, 32, 16, 8)


def _pick_tm(M, K):
    limit = max(_VMEM_BUDGET // 8, 2 << 20)
    for c in _TM_CANDIDATES:
        if c <= M and M % c == 0 and c * K * 2 <= limit:
            return c
    return M


def _pick_tn(N, K):
    limit = max(_VMEM_BUDGET // 4, 4 << 20)
    for c in (512, 256, 128):
        if c <= N and N % c == 0 and 2 * K * c * 2 <= limit:
            return c
    return N


def fused_matmul(a, b, scale, bias, residual=None, relu=False,
                 out_dtype=jnp.bfloat16):
    """act((a @ b) * scale + bias [+ residual]); scale/bias broadcast over rows."""
    M, K = a.shape
    K2, N = b.shape
    assert K == K2
    a = a.astype(jnp.bfloat16)
    b = b.astype(jnp.bfloat16)
    scale = scale.reshape(1, N).astype(jnp.float32)
    bias = bias.reshape(1, N).astype(jnp.float32)
    if residual is not None:
        residual = residual.reshape(M, N).astype(jnp.bfloat16)

    # hardened row tiling: pad M to a sublane multiple so a tile always exists
    Mp = ((M + 7) // 8) * 8
    if Mp != M:
        a = jnp.pad(a, ((0, Mp - M), (0, 0)))
        if residual is not None:
            residual = jnp.pad(residual, ((0, Mp - M), (0, 0)))

    tm = _pick_tm(Mp, K)
    tn = _pick_tn(N, K)
    # give v7x's second TensorCore work when the grid would collapse to 1 step
    if (N // tn) * (Mp // tm) < 2 and tm >= 16 and (tm // 2) % 8 == 0:
        tm //= 2

    grid = (N // tn, Mp // tm)     # weight tile constant across the inner M loop
    has_res = residual is not None
    kernel = _make_matmul_kernel(relu, has_res)

    in_specs = [
        pl.BlockSpec((tm, K), lambda j, i: (i, 0)),
        pl.BlockSpec((K, tn), lambda j, i: (0, j)),
        pl.BlockSpec((1, tn), lambda j, i: (0, j)),
        pl.BlockSpec((1, tn), lambda j, i: (0, j)),
    ]
    args = [a, b, scale, bias]
    if has_res:
        in_specs.append(pl.BlockSpec((tm, tn), lambda j, i: (i, j)))
        args.append(residual)

    out = pl.pallas_call(
        kernel,
        out_shape=jax.ShapeDtypeStruct((Mp, N), out_dtype),
        grid=grid,
        in_specs=in_specs,
        out_specs=pl.BlockSpec((tm, tn), lambda j, i: (i, j)),
        compiler_params=_cparams(2),
    )(*args)
    return out[:M] if Mp != M else out


# ----------------------------------------------------------------------------
# stride-1 3x3 conv as implicit GEMM (in-kernel tap loop, no im2col in HBM)
# ----------------------------------------------------------------------------
def _make_conv3x3_kernel(Ho, Wo, Cin, relu, has_res):
    def kernel(x_ref, w_ref, s_ref, c_ref, *rest):
        if has_res:
            r_ref, o_ref = rest
        else:
            (o_ref,) = rest
        acc = None
        for ky in range(3):
            for kx in range(3):
                xt = x_ref[0, ky:ky + Ho, kx:kx + Wo, :].reshape(Ho * Wo, Cin)
                d = jnp.dot(xt, w_ref[ky * 3 + kx],
                            preferred_element_type=jnp.float32)
                acc = d if acc is None else acc + d
        y = acc * s_ref[...] + c_ref[...]
        if has_res:
            y = y + r_ref[0].astype(jnp.float32)
        if relu:
            y = jnp.maximum(y, 0.0)
        o_ref[0] = y.astype(o_ref.dtype)
    return kernel


def _conv3x3_fused_fits(H, W, Cin, Cout):
    if W % 8 != 0:           # keeps the in-kernel (H,W,C)->(H*W,C) flatten trivial
        return False
    tn = _pick_tn(Cout, 9 * Cin)
    xblk = (H + 2) * (W + 2) * Cin * 2
    wblk = 9 * Cin * tn * 2
    oblk = H * W * tn * 2
    scratch = 6 * H * W * max(Cin, tn) * 4      # tap copies + f32 accumulator
    need = 2 * (xblk + wblk + 2 * oblk) + scratch
    return need <= (_VMEM_BUDGET * 6) // 10


def _conv3x3_s1_fused(x, w, scale, bias, relu, residual, out_dtype):
    N, H, W, Cin = x.shape
    Cout = w.shape[-1]
    Ho, Wo = H, W
    xp = jnp.pad(x.astype(jnp.bfloat16), ((0, 0), (1, 1), (1, 1), (0, 0)))
    wt = w.reshape(9, Cin, Cout).astype(jnp.bfloat16)
    scale = scale.reshape(1, Cout).astype(jnp.float32)
    bias = bias.reshape(1, Cout).astype(jnp.float32)
    tn = _pick_tn(Cout, 9 * Cin)
    if (Cout // tn) * N < 2 and tn >= 256 and (tn // 2) % 128 == 0:
        tn //= 2            # keep >= 2 grid steps for v7x's dual TensorCores
    has_res = residual is not None
    kernel = _make_conv3x3_kernel(Ho, Wo, Cin, relu, has_res)

    in_specs = [
        pl.BlockSpec((1, Ho + 2, Wo + 2, Cin), lambda j, i: (i, 0, 0, 0)),
        pl.BlockSpec((9, Cin, tn), lambda j, i: (0, 0, j)),
        pl.BlockSpec((1, tn), lambda j, i: (0, j)),
        pl.BlockSpec((1, tn), lambda j, i: (0, j)),
    ]
    args = [xp, wt, scale, bias]
    if has_res:
        in_specs.append(pl.BlockSpec((1, Ho * Wo, tn), lambda j, i: (i, 0, j)))
        args.append(residual.reshape(N, Ho * Wo, Cout).astype(jnp.bfloat16))

    out = pl.pallas_call(
        kernel,
        out_shape=jax.ShapeDtypeStruct((N, Ho * Wo, Cout), out_dtype),
        grid=(Cout // tn, N),
        in_specs=in_specs,
        out_specs=pl.BlockSpec((1, Ho * Wo, tn), lambda j, i: (i, 0, j)),
        compiler_params=_cparams(2),
    )(*args)
    return out.reshape(N, Ho, Wo, Cout)


def conv2d_bn_act(x, w, scale, bias, stride=1, padding=0, relu=False,
                  residual=None, out_dtype=jnp.bfloat16):
    """NHWC conv + folded BN + optional residual/ReLU (Pallas matmul core)."""
    kh, kw, Cin, Cout = w.shape
    N, H, W, C = x.shape
    assert C == Cin
    Ho = (H + 2 * padding - kh) // stride + 1
    Wo = (W + 2 * padding - kw) // stride + 1

    if (kh == 3 and kw == 3 and stride == 1 and padding == 1
            and _conv3x3_fused_fits(H, W, Cin, Cout)):
        try:
            return _conv3x3_s1_fused(x, w, scale, bias, relu, residual,
                                     out_dtype)
        except Exception:
            pass            # fall back to the im2col path below

    x = x.astype(jnp.bfloat16)
    if padding:
        x = jnp.pad(x, ((0, 0), (padding, padding), (padding, padding), (0, 0)))
    if kh == 1 and kw == 1:
        xs = x[:, ::stride, ::stride, :] if stride > 1 else x
        patches = xs.reshape(N * Ho * Wo, Cin)
    else:
        # TODO(synk): strided convs (stem 7x7/s2, stage-entry 3x3/s2) still use
        # an XLA-side im2col; they act on the smallest tensors in the net.
        cols = [x[:, i:i + stride * Ho:stride, j:j + stride * Wo:stride, :]
                for i in range(kh) for j in range(kw)]
        patches = jnp.concatenate(cols, axis=-1).reshape(N * Ho * Wo,
                                                         kh * kw * Cin)
    wm = w.reshape(kh * kw * Cin, Cout)
    res2d = None if residual is None else residual.reshape(N * Ho * Wo, Cout)
    out = fused_matmul(patches, wm, scale, bias, residual=res2d, relu=relu,
                       out_dtype=out_dtype)
    return out.reshape(N, Ho, Wo, Cout)


# ----------------------------------------------------------------------------
# MaxPool 3x3 / s2 / p1: 9 taps read in-kernel from the 4 stride-phase views
# ----------------------------------------------------------------------------
def _make_maxpool_kernel(Ho, Wo):
    def kernel(p00, p01, p10, p11, o_ref):
        phases = {(0, 0): p00, (0, 1): p01, (1, 0): p10, (1, 1): p11}
        res = None
        for ky in range(3):
            for kx in range(3):
                ref = phases[(ky % 2, kx % 2)]
                v = ref[0, ky // 2:ky // 2 + Ho, kx // 2:kx // 2 + Wo, :]
                res = v if res is None else jnp.maximum(res, v)
        o_ref[0] = res
    return kernel


def maxpool_3x3_s2(x):
    N, H, W, C = x.shape
    Ho = (H + 2 - 3) // 2 + 1
    Wo = (W + 2 - 3) // 2 + 1
    pad_b = 2 * Ho + 2 - H - 1
    pad_r = 2 * Wo + 2 - W - 1
    xp = jnp.pad(x, ((0, 0), (1, pad_b), (1, pad_r), (0, 0)),
                 constant_values=float("-inf"))
    phases = [xp[:, r::2, c::2, :] for r in (0, 1) for c in (0, 1)]
    tc = 128 if C % 128 == 0 else C
    # TODO(synk): add row-group tiling for very large feature maps.
    kernel = _make_maxpool_kernel(Ho, Wo)
    in_spec = pl.BlockSpec((1, Ho + 1, Wo + 1, tc), lambda i, c: (i, 0, 0, c))
    return pl.pallas_call(
        kernel,
        out_shape=jax.ShapeDtypeStruct((N, Ho, Wo, C), x.dtype),
        grid=(N, C // tc),
        in_specs=[in_spec] * 4,
        out_specs=pl.BlockSpec((1, Ho, Wo, tc), lambda i, c: (i, 0, 0, c)),
        compiler_params=_cparams(2),
    )(*phases)


# ----------------------------------------------------------------------------
# ConvTranspose2d(3, s=2, p=1, op=1) + BN + ReLU: fused sub-pixel phase kernel
# writing an interleaved (N, H, 2, W, 2*Cout) layout (free reshape afterwards)
# ----------------------------------------------------------------------------
def _make_deconv_kernel(H, W, Cin, Cout):
    def kernel(x_ref, w_ref, s_ref, c_ref, o_ref):
        def tap(dy, dx):
            return x_ref[0, dy:dy + H, dx:dx + W, :].reshape(H * W, Cin)
        x00, x01 = tap(0, 0), tap(0, 1)
        x10, x11 = tap(1, 0), tap(1, 1)
        wk = lambda ky, kx: w_ref[ky * 3 + kx]
        dot = lambda a, b: jnp.dot(a, b, preferred_element_type=jnp.float32)
        p00 = dot(x00, wk(1, 1))
        p01 = dot(x00, wk(1, 2)) + dot(x01, wk(1, 0))
        p10 = dot(x00, wk(2, 1)) + dot(x10, wk(0, 1))
        p11 = (dot(x00, wk(2, 2)) + dot(x01, wk(2, 0))
               + dot(x10, wk(0, 2)) + dot(x11, wk(0, 0)))
        s, c = s_ref[...], c_ref[...]

        def fin(p):
            y = jnp.maximum(p * s + c, 0.0)
            return y.astype(o_ref.dtype).reshape(H, W, Cout)

        o_ref[0, :, 0, :, 0:Cout] = fin(p00)
        o_ref[0, :, 0, :, Cout:2 * Cout] = fin(p01)
        o_ref[0, :, 1, :, 0:Cout] = fin(p10)
        o_ref[0, :, 1, :, Cout:2 * Cout] = fin(p11)
    return kernel


def _deconv_fused_fits(H, W, Cin, Cout):
    if W % 8 != 0:
        return False
    xblk = (H + 1) * (W + 1) * Cin * 2
    wblk = 9 * Cin * Cout * 2
    oblk = 4 * H * W * Cout * 2
    scratch = 8 * H * W * max(Cin, Cout) * 4
    need = 2 * (xblk + wblk + oblk) + scratch
    return need <= (_VMEM_BUDGET * 6) // 10


def _deconv_fused(x, w_t, bn_scale, eff_bias):
    Cin, Cout = w_t.shape[0], w_t.shape[1]
    N, H, W, _ = x.shape
    xp = jnp.pad(x.astype(jnp.bfloat16), ((0, 0), (0, 1), (0, 1), (0, 0)))
    wt = jnp.transpose(w_t, (2, 3, 0, 1)).reshape(9, Cin, Cout).astype(jnp.bfloat16)
    scale = bn_scale.reshape(1, Cout).astype(jnp.float32)
    bias = eff_bias.reshape(1, Cout).astype(jnp.float32)
    kernel = _make_deconv_kernel(H, W, Cin, Cout)
    out = pl.pallas_call(
        kernel,
        out_shape=jax.ShapeDtypeStruct((N, H, 2, W, 2 * Cout), jnp.bfloat16),
        grid=(N,),
        in_specs=[
            pl.BlockSpec((1, H + 1, W + 1, Cin), lambda i: (i, 0, 0, 0)),
            pl.BlockSpec((9, Cin, Cout), lambda i: (0, 0, 0)),
            pl.BlockSpec((1, Cout), lambda i: (0, 0)),
            pl.BlockSpec((1, Cout), lambda i: (0, 0)),
        ],
        out_specs=pl.BlockSpec((1, H, 2, W, 2 * Cout),
                               lambda i: (i, 0, 0, 0, 0)),
        compiler_params=_cparams(1),
    )(xp, wt, scale, bias)
    # (N, H, 2, W, 2, Cout) memory order == (N, 2H, 2W, Cout): reshape is free
    return out.reshape(N, 2 * H, 2 * W, Cout)


def _deconv_phases_unfused(x, w_t, bn_scale, eff_bias):
    """Fallback for tiny/odd spatial maps: per-phase matmuls + XLA interleave."""
    Cin, Cout = w_t.shape[0], w_t.shape[1]
    N, H, W, _ = x.shape
    x = x.astype(jnp.bfloat16)
    xp = jnp.pad(x, ((0, 0), (0, 1), (0, 1), (0, 0)))
    x00 = xp[:, :H, :W, :]
    x01 = xp[:, :H, 1:W + 1, :]
    x10 = xp[:, 1:H + 1, :W, :]
    x11 = xp[:, 1:H + 1, 1:W + 1, :]
    wk = lambda ky, kx: w_t[:, :, ky, kx]

    def phase(taps, weights):
        a = jnp.concatenate(taps, axis=-1).reshape(N * H * W, Cin * len(taps))
        b = jnp.concatenate(weights, axis=0)
        o = fused_matmul(a, b, bn_scale, eff_bias, relu=True)
        return o.reshape(N, H, W, Cout)

    p00 = phase([x00], [wk(1, 1)])
    p01 = phase([x00, x01], [wk(1, 2), wk(1, 0)])
    p10 = phase([x00, x10], [wk(2, 1), wk(0, 1)])
    p11 = phase([x00, x01, x10, x11],
                [wk(2, 2), wk(2, 0), wk(0, 2), wk(0, 0)])
    row_e = jnp.stack([p00, p01], axis=3)
    row_o = jnp.stack([p10, p11], axis=3)
    out = jnp.stack([row_e, row_o], axis=2)
    return out.reshape(N, 2 * H, 2 * W, Cout)


def conv_transpose2d_bn_relu(x, w_t, conv_bias, bn_scale, bn_bias):
    Cin, Cout, kh, kw = w_t.shape
    assert kh == 3 and kw == 3
    N, H, W, C = x.shape
    assert C == Cin
    eff_bias = conv_bias * bn_scale + bn_bias      # fold conv bias through BN
    if _deconv_fused_fits(H, W, Cin, Cout):
        try:
            return _deconv_fused(x, w_t, bn_scale, eff_bias)
        except Exception:
            pass
    return _deconv_phases_unfused(x, w_t, bn_scale, eff_bias)


def basic_block(x, blk):
    st = blk['stride']
    if 'sc_w' in blk:
        residual = conv2d_bn_act(x, blk['sc_w'], blk['sc_scale'],
                                 blk['sc_bias'], stride=st, padding=0,
                                 relu=False)
    else:
        residual = x
    out = conv2d_bn_act(x, blk['w1'], blk['s1'], blk['b1'],
                        stride=st, padding=1, relu=True)
    out = conv2d_bn_act(out, blk['w2'], blk['s2'], blk['b2'],
                        stride=1, padding=1, relu=True, residual=residual)
    return out


# ----------------------------------------------------------------------------
# Exact 2x bilinear upsample (align_corners=False) as an edge-padded stencil
# ----------------------------------------------------------------------------
def _make_up2x_kernel(h, w, C):
    def kernel(x_ref, o_ref):
        win = {}
        for dr in (-1, 0, 1):
            for dc in (-1, 0, 1):
                win[(dr, dc)] = x_ref[0, 1 + dr:1 + dr + h,
                                      1 + dc:1 + dc + w, :].astype(jnp.float32)

        def blend(rows, cols):
            acc = None
            for dr, wr in rows:
                for dc, wc in cols:
                    t = (wr * wc) * win[(dr, dc)]
                    acc = t if acc is None else acc + t
            return acc.astype(o_ref.dtype)

        lo = ((-1, 0.25), (0, 0.75))     # output index 2i
        hi = ((0, 0.75), (1, 0.25))      # output index 2i+1
        o_ref[0, :, 0, :, 0:C] = blend(lo, lo)
        o_ref[0, :, 0, :, C:2 * C] = blend(lo, hi)
        o_ref[0, :, 1, :, 0:C] = blend(hi, lo)
        o_ref[0, :, 1, :, C:2 * C] = blend(hi, hi)
    return kernel


def upsample2x_bilinear(x):
    """2x bilinear (align_corners=False); edge clamping reproduces the exact
    torch interpolate result for the 2x case."""
    N, h, w, C = x.shape
    # TODO(synk): add row-group tiling (halo DMA) for very large feature maps.
    xp = jnp.pad(x, ((0, 0), (1, 1), (1, 1), (0, 0)), mode="edge")
    kernel = _make_up2x_kernel(h, w, C)
    out = pl.pallas_call(
        kernel,
        out_shape=jax.ShapeDtypeStruct((N, h, 2, w, 2 * C), x.dtype),
        grid=(N,),
        in_specs=[pl.BlockSpec((1, h + 2, w + 2, C), lambda i: (i, 0, 0, 0))],
        out_specs=pl.BlockSpec((1, h, 2, w, 2 * C), lambda i: (i, 0, 0, 0, 0)),
        compiler_params=_cparams(1),
    )(xp)
    return out.reshape(N, 2 * h, 2 * w, C)


# ----------------------------------------------------------------------------
# Deterministic synthetic parameters (eval-mode BN folded to affine)
# ----------------------------------------------------------------------------
def _kaiming_conv(key, kh, kw, cin, cout):
    fan_out = cout * kh * kw
    std = np.sqrt(2.0 / fan_out)
    return jax.random.normal(key, (kh, kw, cin, cout), jnp.float32) * std


def _bn_eval_params(c, eps=1e-5):
    gamma = jnp.ones((c,), jnp.float32)
    beta = jnp.zeros((c,), jnp.float32)
    mean = jnp.zeros((c,), jnp.float32)
    var = jnp.ones((c,), jnp.float32)
    scale = gamma / jnp.sqrt(var + eps)
    bias = beta - mean * scale
    return scale, bias


def init_params(key, num_classes=4):
    keys = iter(jax.random.split(key, 64))
    p = {'num_classes': num_classes}

    # stem: Conv2d(3, 64, k=7, s=2, p=3) + BN; Cout zero-padded 64 -> 128 so
    # every downstream layer stores lane-dense (128-multiple) channels.
    stem = _kaiming_conv(next(keys), 7, 7, 3, 64)
    p['stem_w'] = jnp.pad(stem, ((0, 0), (0, 0), (0, 0), (0, 64)))
    s, b = _bn_eval_params(64)
    p['stem_s'] = jnp.concatenate([s, jnp.ones((64,), jnp.float32)])
    p['stem_b'] = jnp.concatenate([b, jnp.zeros((64,), jnp.float32)])

    blocks = []
    for cin, cout, nblk, stride in [(64, 128, 2, 1), (128, 256, 2, 2),
                                    (256, 512, 2, 2)]:
        for bidx in range(nblk):
            ci = cin if bidx == 0 else cout
            st = stride if bidx == 0 else 1
            blk = {'stride': st}
            w1 = _kaiming_conv(next(keys), 3, 3, ci, cout)
            need_sc = (st != 1 or ci != cout)
            scw = _kaiming_conv(next(keys), 1, 1, ci, cout) if need_sc else None
            if ci == 64:               # consume the stem's zero-padded channels
                w1 = jnp.pad(w1, ((0, 0), (0, 0), (0, 64), (0, 0)))
                if scw is not None:
                    scw = jnp.pad(scw, ((0, 0), (0, 0), (0, 64), (0, 0)))
            blk['w1'] = w1
            blk['s1'], blk['b1'] = _bn_eval_params(cout)
            blk['w2'] = _kaiming_conv(next(keys), 3, 3, cout, cout)
            blk['s2'], blk['b2'] = _bn_eval_params(cout)
            if need_sc:
                blk['sc_w'] = scw
                blk['sc_scale'], blk['sc_bias'] = _bn_eval_params(cout)
            blocks.append(blk)
    p['blocks'] = blocks

    dec = []
    for cin, cout in [(512, 256), (256, 128), (128, 128)]:
        w = jax.random.normal(next(keys), (cin, cout, 3, 3),
                              jnp.float32) * np.sqrt(1.0 / (cin * 9))
        bb = jax.random.normal(next(keys), (cout,), jnp.float32) * 0.01
        s, beta = _bn_eval_params(cout)
        dec.append({'w': w, 'b': bb, 's': s, 'beta': beta})
    p['decoder'] = dec

    # classifier: Conv2d(128, num_classes, 1) with zero bias (per _init_weights);
    # output lanes zero-padded to 128 for lane-dense stores.
    cls_w = _kaiming_conv(next(keys), 1, 1, 128,
                          num_classes).reshape(128, num_classes)
    p['cls_w_pad'] = jnp.zeros((128, 128),
                               jnp.float32).at[:, :num_classes].set(cls_w)
    p['cls_b_pad'] = jnp.zeros((128,), jnp.float32)
    # TODO(synk): aux_classifier is only used by the training-mode branch and is
    # not part of the eval-mode forward implemented here.
    return p


# ----------------------------------------------------------------------------
# Forward (eval mode)
# ----------------------------------------------------------------------------
def simple_bisenetv2_forward(params, x_nchw):
    N, _, H, W = x_nchw.shape
    assert H % 16 == 0 and W % 16 == 0
    nc = params['num_classes']
    x = jnp.transpose(x_nchw, (0, 2, 3, 1)).astype(jnp.bfloat16)   # NHWC bf16

    # encoder
    h = conv2d_bn_act(x, params['stem_w'], params['stem_s'], params['stem_b'],
                      stride=2, padding=3, relu=True)
    h = maxpool_3x3_s2(h)
    for blk in params['blocks']:
        h = basic_block(h, blk)

    # decoder
    for dec in params['decoder']:
        h = conv_transpose2d_bn_relu(h, dec['w'], dec['b'], dec['s'],
                                     dec['beta'])

    # classifier (1x1, lane-dense padded to 128, bf16) then exact-2x bilinear
    # upsample; only the sliced real classes are cast to f32 at the end.
    n, hh, ww, cd = h.shape
    logits = fused_matmul(h.reshape(n * hh * ww, cd), params['cls_w_pad'],
                          jnp.ones((1, 128), jnp.float32),
                          params['cls_b_pad'], out_dtype=jnp.bfloat16)
    logits = logits.reshape(n, hh, ww, 128)
    up = upsample2x_bilinear(logits)                     # (n, H, W, 128) bf16
    out = up[..., :nc].astype(jnp.float32)
    return jnp.transpose(out, (0, 3, 1, 2))              # NCHW f32


if __name__ == "__main__":
    key = jax.random.PRNGKey(0)
    pkey, xkey = jax.random.split(key)
    params = init_params(pkey, num_classes=4)
    # small input consistent with the module: 3 input channels, /16-divisible HW
    x = jax.random.normal(xkey, (2, 3, 32, 32), jnp.float32)
    out = simple_bisenetv2_forward(params, x)
    out = jax.block_until_ready(out)
    assert out.shape == (2, 4, 32, 32), out.shape
    assert bool(jnp.all(jnp.isfinite(out)))
    print("KERNEL_OK")
</pallas_src>

<mosaic_0001>
module attributes {stable_mosaic.version = 11 : i64} {
  func.func @kernel(%arg0: i32, %arg1: i32, %arg2: memref<256x147xbf16, #tpu.memory_space<vmem>>, %arg3: memref<147x128xbf16, #tpu.memory_space<vmem>>, %arg4: memref<1x128xf32, #tpu.memory_space<vmem>>, %arg5: memref<1x128xf32, #tpu.memory_space<vmem>>, %arg6: memref<256x128xbf16, #tpu.memory_space<vmem>>) attributes {dimension_semantics = [#tpu.dimension_semantics<parallel>, #tpu.dimension_semantics<parallel>], iteration_bounds = array<i64: 1, 2>, scalar_prefetch = 0 : i64, scratch_operands = 0 : i64, tpu.core_type = #tpu.core_type<tc>, window_params = [{transform_indices = @transform_0, window_bounds = array<i64: 256, 147>}, {transform_indices = @transform_1, window_bounds = array<i64: 147, 128>}, {transform_indices = @transform_2, window_bounds = array<i64: 1, 128>}, {transform_indices = @transform_3, window_bounds = array<i64: 1, 128>}, {transform_indices = @transform_4, window_bounds = array<i64: 256, 128>}]} {
    %c0 = arith.constant 0 : index
    %c0_0 = arith.constant 0 : index
    %0 = vector.load %arg2[%c0, %c0_0] : memref<256x147xbf16, #tpu.memory_space<vmem>>, vector<256x147xbf16>
    %c0_1 = arith.constant 0 : index
    %c0_2 = arith.constant 0 : index
    %1 = vector.load %arg3[%c0_1, %c0_2] : memref<147x128xbf16, #tpu.memory_space<vmem>>, vector<147x128xbf16>
    %cst = arith.constant dense<0.000000e+00> : vector<256x128xf32>
    %2 = tpu.matmul %0, %1, %cst {dimension_numbers = #tpu.dot_dimension_numbers<[1], [0], [0], [1], [0, 0, 1, 1], [], []>} : vector<256x147xbf16>, vector<147x128xbf16>, vector<256x128xf32> -> vector<256x128xf32>
    %c0_3 = arith.constant 0 : index
    %c0_4 = arith.constant 0 : index
    %3 = vector.load %arg4[%c0_3, %c0_4] : memref<1x128xf32, #tpu.memory_space<vmem>>, vector<1x128xf32>
    %4 = vector.broadcast %3 : vector<1x128xf32> to vector<256x128xf32>
    %5 = arith.mulf %2, %4 : vector<256x128xf32>
    %c0_5 = arith.constant 0 : index
    %c0_6 = arith.constant 0 : index
    %6 = vector.load %arg5[%c0_5, %c0_6] : memref<1x128xf32, #tpu.memory_space<vmem>>, vector<1x128xf32>
    %7 = vector.broadcast %6 : vector<1x128xf32> to vector<256x128xf32>
    %8 = arith.addf %5, %7 : vector<256x128xf32>
    %cst_7 = arith.constant 0.000000e+00 : f32
    %9 = vector.broadcast %cst_7 : f32 to vector<256x128xf32>
    %10 = arith.maximumf %8, %9 : vector<256x128xf32>
    %11 = arith.truncf %10 : vector<256x128xf32> to vector<256x128xbf16>
    %c0_8 = arith.constant 0 : index
    %c0_9 = arith.constant 0 : index
    %12 = vector.load %arg6[%c0_8, %c0_9] : memref<256x128xbf16, #tpu.memory_space<vmem>>, vector<256x128xbf16>
    tpu.vector_store %arg6[%c0_8, %c0_9], %11 {strides = array<i32>} : memref<256x128xbf16, #tpu.memory_space<vmem>>, vector<256x128xbf16>,
    return
  }
  func.func @transform_0(%arg0: i32, %arg1: i32) -> (i32, i32) {
    %c0_i32 = arith.constant 0 : i32
    %c0_i32_0 = arith.constant 0 : i32
    return %arg1, %c0_i32 : i32, i32
  }
  func.func @transform_1(%arg0: i32, %arg1: i32) -> (i32, i32) {
    %c0_i32 = arith.constant 0 : i32
    %c0_i32_0 = arith.constant 0 : i32
    return %c0_i32, %arg0 : i32, i32
  }
  func.func @transform_2(%arg0: i32, %arg1: i32) -> (i32, i32) {
    %c0_i32 = arith.constant 0 : i32
    %c0_i32_0 = arith.constant 0 : i32
    return %c0_i32, %arg0 : i32, i32
  }
  func.func @transform_3(%arg0: i32, %arg1: i32) -> (i32, i32) {
    %c0_i32 = arith.constant 0 : i32
    %c0_i32_0 = arith.constant 0 : i32
    return %c0_i32, %arg0 : i32, i32
  }
  func.func @transform_4(%arg0: i32, %arg1: i32) -> (i32, i32) {
    %c0_i32 = arith.constant 0 : i32
    return %arg1, %arg0 : i32, i32
  }
}

</mosaic_0001>

<bundles_post_ra>
// kernel: tpu_custom_call.1
= control target key start
LH: loop header
LB: loop body
LE: loop exit
PB: predicated region body
PF: predicated region fallthrough
CT: control target
= control target key end

     0   :  { %9 = vsyncpa [#allocation3], 0  ;;  %s1868_s0 = inlined_call_operand.vmem [shape: bf16[512,147], index: 0, kind: input, shape index: {}]   ;;  %s1869_s1 = inlined_call_operand.vmem [shape: bf16[147,128], index: 1, kind: input, shape index: {}]   ;;  %s1870_s2 = inlined_call_operand.vmem [shape: f32[1,128], index: 2, kind: input, shape index: {}]   ;;  %s1871_s3 = inlined_call_operand.vmem [shape: f32[1,128], index: 3, kind: input, shape index: {}]   ;;  %s1872_s4 = inlined_call_operand.hbm [shape: bf16[512,128], index: 4, kind: output, shape index: {}]  }
   0x1   :  { %11 = vsyncpa [#allocation3 + $0x1], 0  ;;  %s1557_s15 = smov 0   ;;  %s1559_s16 = smov 0  }
   0x2   :  { %s1561_s17 = smov 0   ;;  %s1563_s18 = smov 0  }
   0x3   :  { %s1565_s19 = smov 0   ;;  %s1567_s20 = smov 0  }
   0x4 LB: > { %s1044_s21 = sadd.s32 4294967295, %s1527_s20   ;;  %s1045_s22 = sadd.s32 4294967294, %s1527_s20   ;;  %s1527_s20 = sphi %s1567_s20, %s17_s20   ;;  %s1523_s19 = sphi %s1565_s19, %s1879_s19   ;;  %s1519_s18 = sphi %s1563_s18, %s1878_s18   ;;  %s1515_s17 = sphi %s1561_s17, %s1877_s17   ;;  %s1511_s16 = sphi %s1559_s16, %s1876_s16   ;;  %s1507_s15 = sphi %s1557_s15, %s1875_s15  }
   0x5   : > { %s26_s23 = sadd.s32 1, %s1523_s19  ;;  %s142_s24 = sadd.s32 1, %s1515_s17 }
   0x6   : > { %p27_p0 = scmp.ge.s32.totalorder %s26_s23, 2  ;;  %p152_p1 = scmp.ne.s32.totalorder %s1515_s17, %s1511_s16 }
   0x7   : > { %p153_p2 = scmp.eq.s32.totalorder %s1044_s21, 1  ;;  %p158_p3 = scmp.ne.s32.totalorder %s1511_s16, %s1507_s15 }
   0x8   : > { %s1881_s23 = smov (%p27_p0, %s26_s23), 0  ;;  %p159_p5 = scmp.eq.s32.totalorder %s1045_s22, 1 }
   0x9   : > { %p1597_p4 = por %p153_p2, %p152_p1  ;;  %s137_s26 = ssub.s32 %s1523_s19, %s1881_s23 }
   0xa   : > { %p1051_p6 = scmp.ge.s32.totalorder %s1527_s20, 1  ;;  %p140_p7 = scmp.eq.s32.totalorder %s137_s26, 0 }
   0xb   : > { %p1604_p8 = por %p159_p5, %p158_p3  ;;  %p206_p9 = scmp.lt.s32.totalorder %s1527_s20, 3 }
   0xc   : > { %s1610_s28 = scalar_select %p140_p7, %s1515_s17, %s142_s24  }
   0xd   : > { %p207_p10 = pnand %p1051_p6, %p206_p9 }
   0xe   : > { %s1053_s7 = sshll.u32 (!%p207_p10), %s1519_s18, 5  ;;  %s240_s22 = sand.u32 (!%p207_p10), 1, %s1511_s16  }
   0xf   : > { %210 = sbr.rel (%p207_p10) target bundleno = 318 (0x13e), region = 36  ;;  %p244_p11 = scmp.lt.s32.totalorder (!%p207_p10), %s1053_s7, 63 }
  0x10   : > { %s1283_s29 = sshll.u32 (!%p207_p10), %s1519_s18, 7  ;;  %s917_s8 = scalar_lea.sflag (!%p207_p10), [#allocation3], %s240_s22 }
  0x11   : > { %s929_s6 = scalar_lea.hbm (!%p207_p10), %s1872_s4, %s1283_s29  ;;  %s1469_s13 = scalar_lea.hbm (!%p207_p10), %s1872_s4, 256 }
  0x14   : > { %v1281_v0 = vld [vmem:[%s1869_s1 + $0x38] sm:$0xff]  ;;  %v312_v1 = vld [vmem:[%s1869_s1 + $0x48] sm:$0x3]  ;;  %vm563_vm0 = vcmask 1040384   ;;  %vm564_vm1 = vcmask 1041408   ;;  %v1280_v3 = vld [vmem:[%s1869_s1 + $0x30] sm:$0xff] }
  0x15   : > { %v494_v2 = vunpack.c.l.b16 %v312_v1  ;;  %570 = vmatpush.bf16.msra.mxu0 %v1281_v0  ;;  %1379 = vmatpush.bf16.msra.mxu2 %v1281_v0  ;;  %v1529_v4 = vmov 65535   ;;  %s1883_s7 = smov (!%p244_p11, %s1053_s7), 63  ;;  %v1279_v9 = vld [vmem:[%s1869_s1 + $0x28] sm:$0xff]  ;;  %v1282_v10 = vld [vmem:[%s1869_s1 + $0x40] sm:$0xff]  ;;  %vm514_vm2 = vcmask 154624   ;;  %v1277_v18 = vld [vmem:[%s1869_s1 + $0x18] sm:$0xff] }
  0x16   : > { %v565_v5 = vsel %vm563_vm0, 4294967295, %v1529_v4  ;;  %s1241_s12 = sshll.u32 %s1883_s7, 3  ;;  %v1278_v14 = vld [vmem:[%s1869_s1 + $0x20] sm:$0xff]  ;;  %v1276_v19 = vld [vmem:[%s1869_s1 + $0x10] sm:$0xff]  ;;  %v1275_v20 = vld [vmem:[%s1869_s1 + $0x8] sm:$0xff]  ;;  %s932_s7 = sshll.u32 %s929_s6, 4  ;;  %s933_s7 = int_to_ptr.hbm [resolvable:$true] %s932_s7 }
  0x17   : > { %v504_v6 = vpack.c.b16 %v494_v2, %v494_v2  ;;  %v566_v7 = vsel %vm564_vm1, %v565_v5, 0  ;;  %s1631_s24 = scalar_lea.vmem %s1868_s0, %s1241_s12  ;;  %v1274_v26 = vld [vmem:[%s1869_s1] sm:$0xff]  ;;  %s1463_s9 = sshra.s32 %s933_s7, 4  ;;  %s1464_s9 = int_to_ptr.hbm [resolvable:$true] %s1463_s9 }
  0x18   : > { %v1242_v11 = vld [vmem:[%s1631_s24 + $0x4] sm:$0xf]  ;;  %v1060_v12 = vld [vmem:[%s1631_s24 + $0x8] sm:$0xf0]  ;;  %v1260_v15 = vld [vmem:[%s1631_s24 + $0x94] sm:$0xf]  ;;  %p1470_p1 = scmp.lt.s32.totalorder %s1464_s9, %s1872_s4 }
  0x19   : > { %v568_v8 = vand.u32 %v566_v7, %v504_v6  ;;  %571 = vmatpush.bf16.msra.mxu0 %v1280_v3  ;;  %1380 = vmatpush.bf16.msra.mxu2 %v1280_v3  ;;  %v1063_v13 = vor.u32 %v1242_v11, %v1060_v12  ;;  %v1132_v16 = vld [vmem:[%s1631_s24 + $0x98] sm:$0xf0]  ;;  %v1244_v21 = vld [vmem:[%s1631_s24 + $0x14] sm:$0xf]  ;;  %v1262_v23 = vld [vmem:[%s1631_s24 + $0xa4] sm:$0xf] }
  0x1a   : > { %v1135_v17 = vor.u32 %v1260_v15, %v1132_v16  ;;  %v1068_v22 = vld [vmem:[%s1631_s24 + $0x18] sm:$0xf0]  ;;  %v1140_v24 = vld [vmem:[%s1631_s24 + $0xa8] sm:$0xf0]  ;;  %v1058_v27 = vld [vmem:[%s1631_s24] sm:$0xf] }
  0x1b   : > { %665 = vmatpush.bf16.msra.mxu1 %v568_v8  ;;  %1387 = vmatpush.bf16.msra.mxu3 %v568_v8  ;;  %v1071_v25 = vor.u32 %v1244_v21, %v1068_v22  ;;  %v1243_v28 = vld [vmem:[%s1631_s24 + $0x4] sm:$0xf0]  ;;  %v1122_v29 = vld [vmem:[%s1631_s24 + $0x80] sm:$0xf]  ;;  %v1143_v31 = vor.u32 %v1262_v23, %v1140_v24  ;;  %v1246_v34 = vld [vmem:[%s1631_s24 + $0x24] sm:$0xf] }
  0x1c   : > { %v1259_v30 = vld [vmem:[%s1631_s24 + $0x84] sm:$0xf0]  ;;  %v1059_v32 = vor.u32 %v1243_v28, %v1058_v27  ;;  %v1076_v35 = vld [vmem:[%s1631_s24 + $0x28] sm:$0xf0]  ;;  %v1264_v36 = vld [vmem:[%s1631_s24 + $0xb4] sm:$0xf] }
  0x1d   : > { %572 = vmatpush.bf16.msra.mxu0 %v1279_v9  ;;  %1381 = vmatpush.bf16.msra.mxu2 %v1279_v9  ;;  %v1123_v33 = vor.u32 %v1259_v30, %v1122_v29  ;;  %v1148_v37 = vld [vmem:[%s1631_s24 + $0xb8] sm:$0xf0]  ;;  %v1079_v38 = vor.u32 %v1246_v34, %v1076_v35  ;;  %v1066_v39 = vld [vmem:[%s1631_s24 + $0x10] sm:$0xf]  ;;  %v1245_v40 = vld [vmem:[%s1631_s24 + $0x14] sm:$0xf0] }
  0x1e   : > { %v1130_v41 = vld [vmem:[%s1631_s24 + $0x90] sm:$0xf]  ;;  %v1261_v42 = vld [vmem:[%s1631_s24 + $0x94] sm:$0xf0]  ;;  %v1151_v43 = vor.u32 %v1264_v36, %v1148_v37  ;;  %v1067_v44 = vor.u32 %v1245_v40, %v1066_v39  ;;  %v1248_v46 = vld [vmem:[%s1631_s24 + $0x34] sm:$0xf] }
  0x1f   : > { %666 = vmatpush.bf16.msra.mxu1 %v1282_v10  ;;  %1388 = vmatpush.bf16.msra.mxu3 %v1282_v10  ;;  %v1131_v45 = vor.u32 %v1261_v42, %v1130_v41  ;;  %v1084_v47 = vld [vmem:[%s1631_s24 + $0x38] sm:$0xf0]  ;;  %v1266_v48 = vld [vmem:[%s1631_s24 + $0xc4] sm:$0xf]  ;;  %v1156_v49 = vld [vmem:[%s1631_s24 + $0xc8] sm:$0xf0] }
  0x20   : > { %v1087_v50 = vor.u32 %v1248_v46, %v1084_v47  ;;  %v1074_v51 = vld [vmem:[%s1631_s24 + $0x20] sm:$0xf]  ;;  %v1247_v52 = vld [vmem:[%s1631_s24 + $0x24] sm:$0xf0]  ;;  %v1159_v55 = vor.u32 %v1266_v48, %v1156_v49  ;;  %v1250_v58 = vld [vmem:[%s1631_s24 + $0x44] sm:$0xf] }
  0x21   : > { %573 = vmatpush.bf16.msra.mxu0 %v1278_v14  ;;  %1382 = vmatpush.bf16.msra.mxu2 %v1278_v14  ;;  %v1138_v53 = vld [vmem:[%s1631_s24 + $0xa0] sm:$0xf]  ;;  %v1263_v54 = vld [vmem:[%s1631_s24 + $0xa4] sm:$0xf0]  ;;  %v1075_v56 = vor.u32 %v1247_v52, %v1074_v51  ;;  %v1092_v59 = vld [vmem:[%s1631_s24 + $0x48] sm:$0xf0] }
  0x22   : > { %1220 = vmatmul.msk.bf16.vlgmr.msra.gmra.mxu1 %vm514_vm2, %v1063_v13  ;;  %1229 = vmatmul.msk.bf16.vlgmr.msra.gmra.mxu3 %vm514_vm2, %v1135_v17  ;;  %v1139_v57 = vor.u32 %v1263_v54, %v1138_v53  ;;  %v1268_v60 = vld [vmem:[%s1631_s24 + $0xd4] sm:$0xf]  ;;  %v1164_v61 = vld [vmem:[%s1631_s24 + $0xd8] sm:$0xf0]  ;;  %v1095_v62 = vor.u32 %v1250_v58, %v1092_v59  ;;  %v1082_v63 = vld [vmem:[%s1631_s24 + $0x30] sm:$0xf] }
  0x23   : > { %v1249_v0 = vld [vmem:[%s1631_s24 + $0x34] sm:$0xf0]  ;;  %v1146_v1 = vld [vmem:[%s1631_s24 + $0xb0] sm:$0xf]  ;;  %v1167_v3 = vor.u32 %v1268_v60, %v1164_v61  ;;  %v1252_v6 = vld [vmem:[%s1631_s24 + $0x54] sm:$0xf] }
  0x24   : > { %v1265_v2 = vld [vmem:[%s1631_s24 + $0xb4] sm:$0xf0]  ;;  %v1083_v4 = vor.u32 %v1249_v0, %v1082_v63  ;;  %v1100_v7 = vld [vmem:[%s1631_s24 + $0x58] sm:$0xf0]  ;;  %v1270_v8 = vld [vmem:[%s1631_s24 + $0xe4] sm:$0xf] }
  0x25   : > { %574 = vmatpush.bf16.msra.mxu0 %v1277_v18  ;;  %1383 = vmatpush.bf16.msra.mxu2 %v1277_v18  ;;  %v1147_v5 = vor.u32 %v1265_v2, %v1146_v1  ;;  %v1172_v9 = vld [vmem:[%s1631_s24 + $0xe8] sm:$0xf0]  ;;  %v1103_v10 = vor.u32 %v1252_v6, %v1100_v7  ;;  %v1090_v11 = vld [vmem:[%s1631_s24 + $0x40] sm:$0xf]  ;;  %v1251_v12 = vld [vmem:[%s1631_s24 + $0x44] sm:$0xf0] }
  0x26   : > { %v1154_v13 = vld [vmem:[%s1631_s24 + $0xc0] sm:$0xf]  ;;  %v1267_v14 = vld [vmem:[%s1631_s24 + $0xc4] sm:$0xf0]  ;;  %v1175_v15 = vor.u32 %v1270_v8, %v1172_v9  ;;  %v1091_v16 = vor.u32 %v1251_v12, %v1090_v11  ;;  %v1254_v18 = vld [vmem:[%s1631_s24 + $0x64] sm:$0xf] }
  0x27   : > { %v1155_v17 = vor.u32 %v1267_v14, %v1154_v13  ;;  %v1180_v21 = vld [vmem:[%s1631_s24 + $0xf8] sm:$0xf0]  ;;  %v1098_v23 = vld [vmem:[%s1631_s24 + $0x50] sm:$0xf]  ;;  %v1253_v24 = vld [vmem:[%s1631_s24 + $0x54] sm:$0xf0] }
  0x28   : > { %v1099_v28 = vor.u32 %v1253_v24, %v1098_v23  ;;  %v1256_v30 = vld [vmem:[%s1631_s24 + $0x74] sm:$0xf]  ;;  %v1255_v34 = vld [vmem:[%s1631_s24 + $0x64] sm:$0xf0]  ;;  %v1170_v35 = vld [vmem:[%s1631_s24 + $0xe0] sm:$0xf] }
  0x29   : > { %575 = vmatpush.bf16.msra.mxu0 %v1276_v19  ;;  %1384 = vmatpush.bf16.msra.mxu2 %v1276_v19  ;;  %v1108_v19 = vld [vmem:[%s1631_s24 + $0x68] sm:$0xf0]  ;;  %v1271_v36 = vld [vmem:[%s1631_s24 + $0xe4] sm:$0xf0]  ;;  %v1258_v39 = vld [vmem:[%s1631_s24 + $0x84] sm:$0xf] }
  0x2a   : > { %v1111_v22 = vor.u32 %v1254_v18, %v1108_v19  ;;  %v1124_v40 = vld [vmem:[%s1631_s24 + $0x88] sm:$0xf0]  ;;  %v1114_v42 = vld [vmem:[%s1631_s24 + $0x70] sm:$0xf]  ;;  %v1273_v46 = vld [vmem:[%s1631_s24 + $0xf4] sm:$0xf0] }
  0x2b   : > { %v1127_v41 = vor.u32 %v1258_v39, %v1124_v40  ;;  %v1731_v54 = vld [vmem:[%s1870_s2] ss:$0 sm:$0xff]  ;;  %s1465_s10 = scalar_lea.hbm %s1464_s9, 128 }
  0x2c   : > { %p1466_p12 = scmp.ne.s32.totalorder %s1464_s9, %s1465_s10  ;;  %p1471_p2 = scmp.lt.s32.totalorder %s1469_s13, %s1465_s10 }
  0x2d   : > { %576 = vmatpush.bf16.msra.mxu0 %v1275_v20  ;;  %1385 = vmatpush.bf16.msra.mxu2 %v1275_v20  ;;  %v1272_v20 = vld [vmem:[%s1631_s24 + $0xf4] sm:$0xf] }
  0x2e   : > { %v1183_v27 = vor.u32 %v1272_v20, %v1180_v21  ;;  %p1467_p13 = pnand %p1466_p12, %p1597_p4  ;;  %p1472_p3 = por %p1471_p2, %p1470_p1 }
  0x30   : > { %p1468_p0 = pneg %p1467_p13 }
  0x31   : > { %577 = vmatpush.bf16.msra.mxu0 %v1274_v26  ;;  %1386 = vmatpush.bf16.msra.mxu2 %v1274_v26  ;;  %v1269_v26 = vld [vmem:[%s1631_s24 + $0xd4] sm:$0xf0] }
  0x32   : > { %1221 = vmatmul.msk.bf16.gmra.mxu1 %vm514_vm2, %v1071_v25  ;;  %1230 = vmatmul.msk.bf16.gmra.mxu3 %vm514_vm2, %v1143_v31  ;;  %v1162_v25 = vld [vmem:[%s1631_s24 + $0xd0] sm:$0xf]  ;;  %v1116_v31 = vld [vmem:[%s1631_s24 + $0x78] sm:$0xf0]  ;;  %p1473_p5 = pnand %p1472_p3, %p1468_p0 }
  0x33   : > { %v1163_v29 = vor.u32 %v1269_v26, %v1162_v25 }
  0x34   : > { %578 = vmatmul.bf16.vlgmr.msra.gmra.mxu0 %v1059_v32  ;;  %618 = vmatmul.bf16.vlgmr.msra.gmra.mxu2 %v1123_v33  ;;  %v1119_v32 = vor.u32 %v1256_v30, %v1116_v31  ;;  %v1106_v33 = vld [vmem:[%s1631_s24 + $0x60] sm:$0xf] }
  0x35   : > { %v1107_v37 = vor.u32 %v1255_v34, %v1106_v33 }
  0x42   : > { %1222 = vmatmul.msk.bf16.gmra.mxu1 %vm514_vm2, %v1079_v38  ;;  %1231 = vmatmul.msk.bf16.gmra.mxu3 %vm514_vm2, %v1151_v43  ;;  %v1171_v38 = vor.u32 %v1271_v36, %v1170_v35  ;;  %v1257_v43 = vld [vmem:[%s1631_s24 + $0x74] sm:$0xf0] }
  0x43   : > { %v1115_v47 = vor.u32 %v1257_v43, %v1114_v42 }
  0x44   : > { %583 = vmatmul.bf16.gmra.mxu0 %v1067_v44  ;;  %623 = vmatmul.bf16.gmra.mxu2 %v1131_v45  ;;  %v1178_v45 = vld [vmem:[%s1631_s24 + $0xf0] sm:$0xf]  ;;  %s1052_s24 = sshll.u32 %s240_s22, 7 }
  0x45   : > { %v1179_v48 = vor.u32 %v1273_v46, %v1178_v45  ;;  %s1749_s26 = scalar_lea.vmem [#allocation2], %s1052_s24 }
  0x46   : > { %s930_s18 = sshll.u32 %s1749_s26, 4  ;;  %s931_s18 = int_to_ptr.vmem [resolvable:$true] %s930_s18 }
  0x52   : > { %1223 = vmatmul.msk.bf16.gmra.mxu1 %vm514_vm2, %v1087_v50  ;;  %1232 = vmatmul.msk.bf16.gmra.mxu3 %vm514_vm2, %v1159_v55 }
  0x54   : > { %588 = vmatmul.bf16.gmra.mxu0 %v1075_v56  ;;  %628 = vmatmul.bf16.gmra.mxu2 %v1139_v57  ;;  %v1737_v57 = vld [vmem:[%s1871_s3] ss:$0 sm:$0xff] }
  0x62   : > { %1224 = vmatmul.msk.bf16.gmra.mxu1 %vm514_vm2, %v1095_v62  ;;  %1233 = vmatmul.msk.bf16.gmra.mxu3 %vm514_vm2, %v1167_v3 }
  0x64   : > { %593 = vmatmul.bf16.gmra.mxu0 %v1083_v4  ;;  %633 = vmatmul.bf16.gmra.mxu2 %v1147_v5 }
  0x72   : > { %1225 = vmatmul.msk.bf16.gmra.mxu1 %vm514_vm2, %v1103_v10  ;;  %1234 = vmatmul.msk.bf16.gmra.mxu3 %vm514_vm2, %v1175_v15 }
  0x74   : > { %598 = vmatmul.bf16.gmra.mxu0 %v1091_v16  ;;  %638 = vmatmul.bf16.gmra.mxu2 %v1155_v17 }
  0x82   : > { %1226 = vmatmul.msk.bf16.gmra.mxu1 %vm514_vm2, %v1111_v22  ;;  %1235 = vmatmul.msk.bf16.gmra.mxu3 %vm514_vm2, %v1183_v27 }
  0x84   : > { %603 = vmatmul.bf16.gmra.mxu0 %v1099_v28  ;;  %643 = vmatmul.bf16.gmra.mxu2 %v1163_v29 }
  0x92   : > { %1227 = vmatmul.msk.bf16.gmra.mxu1 %vm514_vm2, %v1119_v32 }
  0x94   : > { %608 = vmatmul.bf16.gmra.mxu0 %v1107_v37  ;;  %648 = vmatmul.bf16.gmra.mxu2 %v1171_v38 }
  0x9f   : > { %v668_v44 = vpop.f32.mrf.mxu1 }
  0xa2   : > { %1228 = vmatmul.msk.bf16.gmra.mxu1 %vm514_vm2, %v1127_v41 }
  0xa4   : > { %613 = vmatmul.bf16.gmra.mxu0 %v1115_v47  ;;  %653 = vmatmul.bf16.gmra.mxu2 %v1179_v48 }
  0xa5   : > { %v713_v51 = vpop.f32.mrf.mxu3 }
  0xa7   : > { %v670_v49 = vpop.f32.mrf.mxu1 }
  0xad   : > { %v715_v59 = vpop.f32.mrf.mxu3 }
  0xaf   : > { %v673_v50 = vpop.f32.mrf.mxu1 }
  0xb1   : > { %v579_v52 = vpop.f32.mrf.mxu0 }
  0xb2   : > { %v669_v53 = vadd.f32 %v668_v44, %v579_v52 }
  0xb4   : > { %v752_v56 = vmul.f32 %v1731_v54, %v669_v53 }
  0xb5   : > { %v718_v7 = vpop.f32.mrf.mxu3 }
  0xb6   : > { %v788_v62 = vadd.f32 %v1737_v57, %v752_v56 }
  0xb7   : > { %v675_v55 = vpop.f32.mrf.mxu1  ;;  %v1739_v58 = vpop.f32.mrf.mxu2 }
  0xb8   : > { %v820_v2 = vmax.f32 %v788_v62, 0.0 }
  0xb9   : > { %v581_v60 = vpop.f32.mrf.mxu0 }
  0xba   : > { %v671_v61 = vadd.f32 %v670_v49, %v581_v60 }
  0xbc   : > { %v753_v63 = vmul.f32 %v1731_v54, %v671_v61 }
  0xbd   : > { %v720_v17 = vpop.f32.mrf.mxu3 }
  0xbe   : > { %v789_v0 = vadd.f32 %v1737_v57, %v753_v63 }
  0xbf   : > { %v678_v1 = vpop.f32.mrf.mxu1  ;;  %v1747_v4 = vpop.f32.mrf.mxu2 }
  0xc0   : > { %v821_v3 = vmax.f32 %v789_v0, 0.0 }
  0xc1   : > { %v584_v5 = vpop.f32.mrf.mxu0 }
  0xc2   : > { %v1287_v6 = vpack.c.bf16 %v821_v3, %v820_v2  ;;  %v674_v8 = vadd.f32 %v673_v50, %v584_v5 }
  0xc4   : > { %1288 = vst [vmem:[%s1749_s26] sm:$0xff] %v1287_v6   ;;  %v754_v10 = vmul.f32 %v1731_v54, %v674_v8 }
  0xc5   : > { %v723_v32 = vpop.f32.mrf.mxu3 }
  0xc6   : > { %v790_v15 = vadd.f32 %v1737_v57, %v754_v10 }
  0xc7   : > { %v680_v9 = vpop.f32.mrf.mxu1  ;;  %v624_v11 = vpop.f32.mrf.mxu2 }
  0xc8   : > { %v714_v14 = vadd.f32 %v713_v51, %v624_v11  ;;  %v822_v21 = vmax.f32 %v790_v15, 0.0 }
  0xc9   : > { %v586_v12 = vpop.f32.mrf.mxu0 }
  0xca   : > { %v676_v13 = vadd.f32 %v675_v55, %v586_v12  ;;  %v770_v20 = vmul.f32 %v1731_v54, %v714_v14 }
  0xcc   : > { %v755_v16 = vmul.f32 %v1731_v54, %v676_v13  ;;  %v806_v27 = vadd.f32 %v1737_v57, %v770_v20 }
  0xcd   : > { %v725_v49 = vpop.f32.mrf.mxu3 }
  0xce   : > { %v791_v18 = vadd.f32 %v1737_v57, %v755_v16  ;;  %v838_v33 = vmax.f32 %v806_v27, 0.0 }
  0xcf   : > { %v683_v19 = vpop.f32.mrf.mxu1  ;;  %v626_v23 = vpop.f32.mrf.mxu2 }
  0xd0   : > { %v823_v22 = vmax.f32 %v791_v18, 0.0  ;;  %v716_v24 = vadd.f32 %v715_v59, %v626_v23 }
  0xd1   : > { %v589_v25 = vpop.f32.mrf.mxu0 }
  0xd2   : > { %v1292_v26 = vpack.c.bf16 %v823_v22, %v822_v21  ;;  %v771_v28 = vmul.f32 %v1731_v54, %v716_v24  ;;  %v679_v29 = vadd.f32 %v678_v1, %v589_v25 }
  0xd4   : > { %1364 = vst [vmem:[%s1749_s26 + $0x8] sm:$0xff] %v1292_v26   ;;  %v807_v30 = vadd.f32 %v1737_v57, %v771_v28  ;;  %v756_v35 = vmul.f32 %v1731_v54, %v679_v29 }
  0xd5   : > { %v728_v5 = vpop.f32.mrf.mxu3 }
  0xd6   : > { %v839_v34 = vmax.f32 %v807_v30, 0.0  ;;  %v792_v41 = vadd.f32 %v1737_v57, %v756_v35 }
  0xd7   : > { %v685_v31 = vpop.f32.mrf.mxu1  ;;  %v629_v36 = vpop.f32.mrf.mxu2 }
  0xd8   : > { %v1332_v37 = vpack.c.bf16 %v839_v34, %v838_v33  ;;  %v719_v40 = vadd.f32 %v718_v7, %v629_v36  ;;  %v824_v46 = vmax.f32 %v792_v41, 0.0 }
  0xd9   : > { %v591_v38 = vpop.f32.mrf.mxu0 }
  0xda   : > { %v681_v39 = vadd.f32 %v680_v9, %v591_v38  ;;  %1372 = vst [vmem:[%s1749_s26 + $0x48] sm:$0xff] %v1332_v37   ;;  %v772_v45 = vmul.f32 %v1731_v54, %v719_v40 }
  0xdc   : > { %v757_v42 = vmul.f32 %v1731_v54, %v681_v39  ;;  %v808_v53 = vadd.f32 %v1737_v57, %v772_v45 }
  0xdd   : > { %v730_v21 = vpop.f32.mrf.mxu3 }
  0xde   : > { %v793_v43 = vadd.f32 %v1737_v57, %v757_v42  ;;  %v840_v61 = vmax.f32 %v808_v53, 0.0 }
  0xdf   : > { %v688_v44 = vpop.f32.mrf.mxu1  ;;  %v631_v48 = vpop.f32.mrf.mxu2 }
  0xe0   : > { %v825_v47 = vmax.f32 %v793_v43, 0.0  ;;  %v721_v50 = vadd.f32 %v720_v17, %v631_v48 }
  0xe1   : > { %v594_v51 = vpop.f32.mrf.mxu0 }
  0xe2   : > { %v1297_v52 = vpack.c.bf16 %v825_v47, %v824_v46  ;;  %v773_v55 = vmul.f32 %v1731_v54, %v721_v50  ;;  %v684_v56 = vadd.f32 %v683_v19, %v594_v51 }
  0xe4   : > { %1365 = vst [vmem:[%s1749_s26 + $0x10] sm:$0xff] %v1297_v52   ;;  %v809_v59 = vadd.f32 %v1737_v57, %v773_v55  ;;  %v758_v63 = vmul.f32 %v1731_v54, %v684_v56 }
  0xe5   : > { %v733_v36 = vpop.f32.mrf.mxu3 }
  0xe6   : > { %v841_v62 = vmax.f32 %v809_v59, 0.0  ;;  %v794_v7 = vadd.f32 %v1737_v57, %v758_v63 }
  0xe7   : > { %v690_v60 = vpop.f32.mrf.mxu1  ;;  %v634_v0 = vpop.f32.mrf.mxu2 }
  0xe8   : > { %v1337_v1 = vpack.c.bf16 %v841_v62, %v840_v61  ;;  %v724_v6 = vadd.f32 %v723_v32, %v634_v0  ;;  %v826_v12 = vmax.f32 %v794_v7, 0.0 }
  0xe9   : > { %v596_v2 = vpop.f32.mrf.mxu0 }
  0xea   : > { %v686_v3 = vadd.f32 %v685_v31, %v596_v2  ;;  %1373 = vst [vmem:[%s1749_s26 + $0x50] sm:$0xff] %v1337_v1   ;;  %v774_v11 = vmul.f32 %v1731_v54, %v724_v6 }
  0xec   : > { %v759_v8 = vmul.f32 %v1731_v54, %v686_v3  ;;  %v810_v18 = vadd.f32 %v1737_v57, %v774_v11 }
  0xed   : > { %v735_v53 = vpop.f32.mrf.mxu3 }
  0xee   : > { %v795_v9 = vadd.f32 %v1737_v57, %v759_v8  ;;  %v842_v24 = vmax.f32 %v810_v18, 0.0 }
  0xef   : > { %v693_v10 = vpop.f32.mrf.mxu1  ;;  %v636_v14 = vpop.f32.mrf.mxu2 }
  0xf0   : > { %v827_v13 = vmax.f32 %v795_v9, 0.0  ;;  %v726_v15 = vadd.f32 %v725_v49, %v636_v14 }
  0xf1   : > { %v599_v16 = vpop.f32.mrf.mxu0 }
  0xf2   : > { %v1302_v17 = vpack.c.bf16 %v827_v13, %v826_v12  ;;  %v775_v19 = vmul.f32 %v1731_v54, %v726_v15  ;;  %v689_v20 = vadd.f32 %v688_v44, %v599_v16 }
  0xf4   : > { %1366 = vst [vmem:[%s1749_s26 + $0x18] sm:$0xff] %v1302_v17   ;;  %v811_v22 = vadd.f32 %v1737_v57, %v775_v19  ;;  %v760_v26 = vmul.f32 %v1731_v54, %v689_v20 }
  0xf5   : > { %v738_v9 = vpop.f32.mrf.mxu3 }
  0xf6   : > { %v843_v25 = vmax.f32 %v811_v22, 0.0  ;;  %v796_v32 = vadd.f32 %v1737_v57, %v760_v26 }
  0xf7   : > { %v695_v23 = vpop.f32.mrf.mxu1  ;;  %v639_v27 = vpop.f32.mrf.mxu2 }
  0xf8   : > { %v1342_v28 = vpack.c.bf16 %v843_v25, %v842_v24  ;;  %v729_v31 = vadd.f32 %v728_v5, %v639_v27  ;;  %v828_v38 = vmax.f32 %v796_v32, 0.0 }
  0xf9   : > { %v601_v29 = vpop.f32.mrf.mxu0 }
  0xfa   : > { %v691_v30 = vadd.f32 %v690_v60, %v601_v29  ;;  %1374 = vst [vmem:[%s1749_s26 + $0x58] sm:$0xff] %v1342_v28   ;;  %v776_v37 = vmul.f32 %v1731_v54, %v729_v31 }
  0xfc   : > { %v761_v33 = vmul.f32 %v1731_v54, %v691_v30  ;;  %v812_v44 = vadd.f32 %v1737_v57, %v776_v37 }
  0xfd   : > { %v740_v24 = vpop.f32.mrf.mxu3 }
  0xfe   : > { %v797_v34 = vadd.f32 %v1737_v57, %v761_v33  ;;  %v844_v49 = vmax.f32 %v812_v44, 0.0 }
  0xff   : > { %v698_v35 = vpop.f32.mrf.mxu1  ;;  %v641_v40 = vpop.f32.mrf.mxu2 }
 0x100   : > { %v829_v39 = vmax.f32 %v797_v34, 0.0  ;;  %v731_v41 = vadd.f32 %v730_v21, %v641_v40 }
 0x101   : > { %v604_v42 = vpop.f32.mrf.mxu0 }
 0x102   : > { %v1307_v43 = vpack.c.bf16 %v829_v39, %v828_v38  ;;  %v777_v45 = vmul.f32 %v1731_v54, %v731_v41  ;;  %v694_v46 = vadd.f32 %v693_v10, %v604_v42 }
 0x104   : > { %1367 = vst [vmem:[%s1749_s26 + $0x20] sm:$0xff] %v1307_v43   ;;  %v813_v47 = vadd.f32 %v1737_v57, %v777_v45  ;;  %v762_v51 = vmul.f32 %v1731_v54, %v694_v46 }
 0x105   : > { %v743_v41 = vpop.f32.mrf.mxu3 }
 0x106   : > { %v845_v50 = vmax.f32 %v813_v47, 0.0  ;;  %v798_v61 = vadd.f32 %v1737_v57, %v762_v51 }
 0x107   : > { %v700_v48 = vpop.f32.mrf.mxu1  ;;  %v644_v52 = vpop.f32.mrf.mxu2 }
 0x108   : > { %v1347_v55 = vpack.c.bf16 %v845_v50, %v844_v49  ;;  %v734_v60 = vadd.f32 %v733_v36, %v644_v52  ;;  %v830_v2 = vmax.f32 %v798_v61, 0.0 }
 0x109   : > { %v606_v56 = vpop.f32.mrf.mxu0 }
 0x10a   : > { %v696_v59 = vadd.f32 %v695_v23, %v606_v56  ;;  %1375 = vst [vmem:[%s1749_s26 + $0x60] sm:$0xff] %v1347_v55   ;;  %v778_v1 = vmul.f32 %v1731_v54, %v734_v60 }
 0x10c   : > { %v763_v62 = vmul.f32 %v1731_v54, %v696_v59  ;;  %v814_v10 = vadd.f32 %v1737_v57, %v778_v1 }
 0x10e   : > { %v799_v63 = vadd.f32 %v1737_v57, %v763_v62  ;;  %v846_v15 = vmax.f32 %v814_v10, 0.0 }
 0x10f   : > { %v703_v0 = vpop.f32.mrf.mxu1  ;;  %v646_v5 = vpop.f32.mrf.mxu2 }
 0x110   : > { %v831_v3 = vmax.f32 %v799_v63, 0.0  ;;  %v736_v6 = vadd.f32 %v735_v53, %v646_v5 }
 0x111   : > { %v609_v7 = vpop.f32.mrf.mxu0 }
 0x112   : > { %v1312_v8 = vpack.c.bf16 %v831_v3, %v830_v2  ;;  %v779_v11 = vmul.f32 %v1731_v54, %v736_v6  ;;  %v699_v12 = vadd.f32 %v698_v35, %v609_v7 }
 0x114   : > { %1368 = vst [vmem:[%s1749_s26 + $0x28] sm:$0xff] %v1312_v8   ;;  %v815_v13 = vadd.f32 %v1737_v57, %v779_v11  ;;  %v764_v17 = vmul.f32 %v1731_v54, %v699_v12 }
 0x116   : > { %v847_v16 = vmax.f32 %v815_v13, 0.0  ;;  %v800_v23 = vadd.f32 %v1737_v57, %v764_v17 }
 0x117   : > { %v705_v14 = vpop.f32.mrf.mxu1  ;;  %v649_v18 = vpop.f32.mrf.mxu2 }
 0x118   : > { %v1352_v19 = vpack.c.bf16 %v847_v16, %v846_v15  ;;  %v739_v22 = vadd.f32 %v738_v9, %v649_v18  ;;  %v832_v29 = vmax.f32 %v800_v23, 0.0 }
 0x119   : > { %v611_v20 = vpop.f32.mrf.mxu0 }
 0x11a   : > { %v701_v21 = vadd.f32 %v700_v48, %v611_v20  ;;  %1376 = vst [vmem:[%s1749_s26 + $0x68] sm:$0xff] %v1352_v19   ;;  %v780_v28 = vmul.f32 %v1731_v54, %v739_v22 }
 0x11c   : > { %v765_v25 = vmul.f32 %v1731_v54, %v701_v21  ;;  %v816_v36 = vadd.f32 %v1737_v57, %v780_v28 }
 0x11e   : > { %v801_v26 = vadd.f32 %v1737_v57, %v765_v25  ;;  %v848_v43 = vmax.f32 %v816_v36, 0.0 }
 0x11f   : > { %v708_v27 = vpop.f32.mrf.mxu1  ;;  %v651_v31 = vpop.f32.mrf.mxu2 }
 0x120   : > { %v833_v30 = vmax.f32 %v801_v26, 0.0  ;;  %v709_v32 = vadd.f32 %v708_v27, %v1739_v58  ;;  %v741_v33 = vadd.f32 %v740_v24, %v651_v31 }
 0x121   : > { %v614_v34 = vpop.f32.mrf.mxu0 }
 0x122   : > { %v1317_v35 = vpack.c.bf16 %v833_v30, %v832_v29  ;;  %v781_v37 = vmul.f32 %v1731_v54, %v741_v33  ;;  %v704_v38 = vadd.f32 %v703_v0, %v614_v34  ;;  %v768_v39 = vmul.f32 %v1731_v54, %v709_v32  ;;  %v745_v0 = vpop.f32.mrf.mxu3 }
 0x124   : > { %1369 = vst [vmem:[%s1749_s26 + $0x30] sm:$0xff] %v1317_v35   ;;  %v817_v40 = vadd.f32 %v1737_v57, %v781_v37  ;;  %v766_v45 = vmul.f32 %v1731_v54, %v704_v38  ;;  %v804_v47 = vadd.f32 %v1737_v57, %v768_v39 }
 0x126   : > { %v849_v44 = vmax.f32 %v817_v40, 0.0  ;;  %v802_v55 = vadd.f32 %v1737_v57, %v766_v45  ;;  %v836_v56 = vmax.f32 %v804_v47, 0.0 }
 0x127   : > { %v710_v42 = vpop.f32.mrf.mxu1  ;;  %v654_v46 = vpop.f32.mrf.mxu2 }
 0x128   : > { %v711_v58 = vadd.f32 %v710_v42, %v1747_v4  ;;  %v1357_v48 = vpack.c.bf16 %v849_v44, %v848_v43  ;;  %v744_v53 = vadd.f32 %v743_v41, %v654_v46  ;;  %v834_v63 = vmax.f32 %v802_v55, 0.0 }
 0x129   : > { %v616_v50 = vpop.f32.mrf.mxu0 }
 0x12a   : > { %v769_v49 = vmul.f32 %v1731_v54, %v711_v58  ;;  %v706_v51 = vadd.f32 %v705_v14, %v616_v50  ;;  %1377 = vst [vmem:[%s1749_s26 + $0x70] sm:$0xff] %v1357_v48   ;;  %v782_v62 = vmul.f32 %v1731_v54, %v744_v53 }
 0x12c   : > { %v805_v52 = vadd.f32 %v1737_v57, %v769_v49  ;;  %v767_v4 = vmul.f32 %v1731_v54, %v706_v51  ;;  %v818_v6 = vadd.f32 %v1737_v57, %v782_v62 }
 0x12e   : > { %v837_v59 = vmax.f32 %v805_v52, 0.0  ;;  %v803_v60 = vadd.f32 %v1737_v57, %v767_v4  ;;  %v850_v9 = vmax.f32 %v818_v6, 0.0 }
 0x12f   : > { %v656_v2 = vpop.f32.mrf.mxu2 }
 0x130   : > { %v1327_v61 = vpack.c.bf16 %v837_v59, %v836_v56  ;;  %v835_v1 = vmax.f32 %v803_v60, 0.0  ;;  %v746_v3 = vadd.f32 %v745_v0, %v656_v2 }
 0x132   : > { %1371 = vst [vmem:[%s1749_s26 + $0x40] sm:$0xff] %v1327_v61   ;;  %v1322_v5 = vpack.c.bf16 %v835_v1, %v834_v63  ;;  %v783_v7 = vmul.f32 %v1731_v54, %v746_v3 }
 0x134   : > { %1370 = vst [vmem:[%s1749_s26 + $0x38] sm:$0xff] %v1322_v5   ;;  %v819_v8 = vadd.f32 %v1737_v57, %v783_v7 }
 0x136   : > { %v851_v10 = vmax.f32 %v819_v8, 0.0 }
 0x138   : > { %v1362_v11 = vpack.c.bf16 %v851_v10, %v850_v9 }
 0x13a   : > { %1378 = vst [vmem:[%s1749_s26 + $0x78] sm:$0xff] %v1362_v11  }
 0x13b   : > { %1476 = shalt.err (!%p1473_p5)
}
 0x13c   : > { %s1530_s22 = smov 64   ;;  %s1531_s24 = smov 4  }
 0x13d   : > { %1389 = dma.vmem_to_hbm [thread:$0]  (%p1597_p4), %s931_s18, 2048, %s933_s7, %s917_s8, %s1530_s22, %s1530_s22, %s1531_s24  }
 0x13e PF: > { %p1395_p6 = scmp.ge.s32.totalorder %s1527_s20, 2  ;;  %s947_s26 = sand.u32 1, %s1507_s15  }
 0x13f   : > { %s948_s29 = scalar_lea.sflag [#allocation3], %s947_s26 }
 0x140   : > { %p1392_p7 = pnand %p1395_p6, %p1604_p8 }
 0x142   : > { %p1393_p9 = pneg %p1392_p7 }
 0x144   : > { %1502 = dma.done.wait (%p1393_p9), %s948_s29, 2048  }
 0x145   : > { %1504 = vsyncadd (%p1393_p9), %s948_s29, 4294965248  ;;  %s17_s20 = sadd.s32 1, %s1527_s20   ;;  %s1875_s15 = smov %s1511_s16 }
 0x146   : > { %p14_p10 = scmp.ge.s32.totalorder %s17_s20, 4   ;;  %s1876_s16 = smov %s1515_s17 }
 0x147   : > { %s1877_s17 = smov %s1610_s28  ;;  %s1878_s18 = smov %s1523_s19 }
 0x148   : > { %s1879_s19 = smov %s1881_s23  ;;  %16 = sbr.rel (!%p14_p10) target bundleno = 4 (0x4), region = 80 }
 0x14d   :  { %954 = vsyncpa [#allocation3], 1 }
 0x14e   :  { %956 = vsyncpa [#allocation3 + $0x1], 1 }

</bundles_post_ra>
